<compile_context>
chip_gen: v7x
topology: tpu7x:2x2x1
jax: 0.10.0
libtpu: 0.0.40
codegen_flags: <defaults>
</compile_context>

<pallas_src>
import functools

import jax
import jax.numpy as jnp
from jax import lax
from jax.experimental import pallas as pl
from jax.experimental.pallas import tpu as pltpu


def _basic_conv_kernel(x_ref, mask_ref,
                       s1_ref, t1_ref,
                       w1_ref, sh2_ref,
                       w2_ref, b2_ref,
                       o_ref, *, W_img, K):
    # One grid step processes Nb images, channel-major, flat spatial (lane-dense).
    #   x_ref:    (Cpad, L)   L = Nb*H*W, f32 (zero-padded input channels)
    #   mask_ref: (K*K, L)    1.0 where tap (dh,dw) reads inside its own image, else 0.0
    #   s1/t1:    (Cpad, 1)   BN1 scale / shift (broadcast over lanes)
    #   w1_ref:   (Cmid, K*K*Cpad)  conv1 weights with BN2 scale folded in (f32 or bf16)
    #   sh2_ref:  (Cmid, 1)   folded  s2*b1 + t2
    #   w2_ref:   (Cout, K*K*Cmid)  conv2 weights (f32 or bf16)
    #   b2_ref:   (Cout, 1)   conv2 bias
    #   o_ref:    (Cout, L)   output, lane-dense
    L = x_ref.shape[-1]
    P = K // 2
    masks = mask_ref[...]                                       # (K*K, L) f32

    def conv_same(a, w_ref, post_shift):
        # a: (c, L) f32.  One 'same' conv == one MXU matmul of (c_out, K*K*c) x (K*K*c, L).
        # Each im2col tap is an XLU lane rotation of the flat activation; reads that cross
        # a row / image boundary are exactly the out-of-image reads and are masked to zero.
        wmat = w_ref[...]
        taps = []
        for dh in range(K):
            for dw in range(K):
                t = dh * K + dw
                delta = (dh - P) * W_img + (dw - P)
                if delta == 0:
                    taps.append(a)
                else:
                    # shifted[p] == a[(p + delta) % L]
                    rolled = pltpu.roll(a, shift=(-delta) % L, axis=1)
                    taps.append(rolled * masks[t:t + 1, :])
        patch = jnp.concatenate(taps, axis=0).astype(wmat.dtype)   # (K*K*c, L), aligned slabs
        out = jnp.dot(wmat, patch, preferred_element_type=jnp.float32)
        return out + post_shift

    x = x_ref[...]                                               # (Cpad, L)
    # Stage 1: BN1 -> ReLU -> Conv1   (conv1 bias + BN2 affine folded into w1 / sh2)
    a1 = jnp.maximum(x * s1_ref[...] + t1_ref[...], 0.0)
    mid = conv_same(a1, w1_ref, sh2_ref[...])                    # == (conv1(a1)+b1)*s2 + t2
    # Stage 2: ReLU -> Conv2 (+ b2)
    a2 = jnp.maximum(mid, 0.0)
    o_ref[...] = conv_same(a2, w2_ref, b2_ref[...])


def _tap_masks(H, W, K, n_tile):
    """(K*K, n_tile*H*W) float mask: 1.0 where the shifted read stays inside its image."""
    P = K // 2
    hh = jnp.arange(H).reshape(H, 1)
    ww = jnp.arange(W).reshape(1, W)
    rows = []
    for dh in range(K):
        for dw in range(K):
            sh, sw = dh - P, dw - P
            valid = ((hh + sh >= 0) & (hh + sh < H) &
                     (ww + sw >= 0) & (ww + sw < W))
            rows.append(valid.reshape(H * W))
    m = jnp.stack(rows, axis=0).astype(jnp.float32)              # (K*K, H*W)
    return jnp.tile(m, (1, n_tile))                              # (K*K, n_tile*H*W)


def basic_conv_forward(x_nchw, p, *, images_per_block=None, use_bf16_matmul=False):
    """Full BasicConv forward. Input/output NCHW (PyTorch convention)."""
    N, Cin, H, W = x_nchw.shape
    K = p["w1"].shape[0]
    Cmid = p["w1"].shape[-1]
    Cout = p["w2"].shape[-1]
    HW = H * W

    # Images per grid step.  Default keeps the grid length 2 (when N is even) so both v7x
    # TensorCores get work; on single-TC chips (v5e/v6e) pass images_per_block=N to merge
    # everything into one grid step (halves the fixed per-step overhead).
    if images_per_block is None:
        images_per_block = N // 2 if (N % 2 == 0 and N >= 2) else N
    Nb = images_per_block
    assert N % Nb == 0
    Lb = Nb * HW
    assert Lb % 128 == 0, "images_per_block*H*W must be lane-aligned"
    # TODO(synk): for larger H*W / channels add a lane-axis (HW column block) grid dimension
    # instead of growing the full-image im2col patch (v7x has only 64 MiB VMEM).

    # Pad input channels to a full sublane group (multiple of 8); matching weight columns
    # are zero so the result is unchanged.
    Cpad = ((Cin + 7) // 8) * 8
    mm_dtype = jnp.bfloat16 if use_bf16_matmul else jnp.float32

    # Layout: (N,C,H,W) -> (C, N*H*W)  channel-major, lane-dense flat spatial.
    x_cnl = jnp.transpose(x_nchw.astype(jnp.float32), (1, 0, 2, 3)).reshape(Cin, N * HW)
    x_cnl = jnp.pad(x_cnl, ((0, Cpad - Cin), (0, 0)))

    masks = _tap_masks(H, W, K, Nb)                              # (K*K, Lb)

    def col(v, c_to=None, pad_value=0.0):
        v = v.astype(jnp.float32)
        if c_to is not None and c_to > v.shape[0]:
            v = jnp.pad(v, (0, c_to - v.shape[0]), constant_values=pad_value)
        return v.reshape(-1, 1)

    def wmat(w_hwio, ci_pad):                                    # (K,K,Ci,Co) -> (Co, K*K*ci_pad)
        kk, _, ci, co = w_hwio.shape
        if ci_pad > ci:
            w_hwio = jnp.pad(w_hwio, ((0, 0), (0, 0), (0, ci_pad - ci), (0, 0)))
        return w_hwio.reshape(kk * kk * ci_pad, co).T.astype(jnp.float32)

    # Fold conv1 bias + BN2 affine into the stage-1 weights / shift.
    s2 = p["scale2"].astype(jnp.float32)
    t2 = p["shift2"].astype(jnp.float32)
    w1m = (s2[:, None] * wmat(p["w1"], Cpad)).astype(mm_dtype)   # (Cmid, K*K*Cpad)
    sh2 = (s2 * p["b1"].astype(jnp.float32) + t2).reshape(-1, 1)  # (Cmid, 1)
    w2m = wmat(p["w2"], Cmid).astype(mm_dtype)                    # (Cout, K*K*Cmid)
    b2 = col(p["b2"])

    kernel = functools.partial(_basic_conv_kernel, W_img=W, K=K)

    out_flat = pl.pallas_call(
        kernel,
        out_shape=jax.ShapeDtypeStruct((Cout, N * HW), jnp.float32),
        grid_spec=pltpu.PrefetchScalarGridSpec(
            num_scalar_prefetch=0,
            grid=(N // Nb,),
            in_specs=[
                pl.BlockSpec((Cpad, Lb), lambda g: (0, g)),             # x
                pl.BlockSpec((K * K, Lb), lambda g: (0, 0)),            # tap masks
                pl.BlockSpec((Cpad, 1), lambda g: (0, 0)),              # BN1 scale
                pl.BlockSpec((Cpad, 1), lambda g: (0, 0)),              # BN1 shift
                pl.BlockSpec((Cmid, K * K * Cpad), lambda g: (0, 0)),   # w1 (BN2-folded)
                pl.BlockSpec((Cmid, 1), lambda g: (0, 0)),              # folded shift2'
                pl.BlockSpec((Cout, K * K * Cmid), lambda g: (0, 0)),   # w2
                pl.BlockSpec((Cout, 1), lambda g: (0, 0)),              # b2
            ],
            out_specs=pl.BlockSpec((Cout, Lb), lambda g: (0, g)),
        ),
        compiler_params=pltpu.CompilerParams(dimension_semantics=("parallel",)),
    )(x_cnl, masks,
      col(p["scale1"], Cpad, 1.0), col(p["shift1"], Cpad, 0.0),
      w1m, sh2, w2m, b2)

    # (Cout, N*H*W) -> (N, Cout, H, W)
    return jnp.transpose(out_flat.reshape(Cout, N, H, W), (1, 0, 2, 3))


def init_params(key, in_channels, out_channels, kernel=3, mid_channels=None):
    if not mid_channels:
        mid_channels = out_channels
    eps = 1e-5
    ks = jax.random.split(key, 12)

    def bn_params(kg, kb, km, kv, c):
        gamma = 1.0 + 0.1 * jax.random.normal(kg, (c,), jnp.float32)
        beta = 0.1 * jax.random.normal(kb, (c,), jnp.float32)
        mean = 0.1 * jax.random.normal(km, (c,), jnp.float32)
        var = jnp.abs(jax.random.normal(kv, (c,), jnp.float32)) + 0.5
        scale = gamma / jnp.sqrt(var + eps)
        shift = beta - mean * scale
        return scale, shift

    scale1, shift1 = bn_params(ks[0], ks[1], ks[2], ks[3], in_channels)
    scale2, shift2 = bn_params(ks[4], ks[5], ks[6], ks[7], mid_channels)
    # conv weights in HWIO layout (synthetic deterministic init)
    w1 = 0.1 * jax.random.normal(ks[8], (kernel, kernel, in_channels, mid_channels), jnp.float32)
    b1 = 0.1 * jax.random.normal(ks[9], (mid_channels,), jnp.float32)
    w2 = 0.1 * jax.random.normal(ks[10], (kernel, kernel, mid_channels, out_channels), jnp.float32)
    b2 = 0.1 * jax.random.normal(ks[11], (out_channels,), jnp.float32)
    return dict(scale1=scale1, shift1=shift1, w1=w1, b1=b1,
                scale2=scale2, shift2=shift2, w2=w2, b2=b2)


def _reference_forward(x_nchw, p):
    """Pure-JAX reference (same semantics) for validation, in NCHW."""
    def stage(x, scale, shift, w, b):
        y = jnp.maximum(x * scale.reshape(1, -1, 1, 1) + shift.reshape(1, -1, 1, 1), 0.0)
        y = lax.conv_general_dilated(
            y, w, window_strides=(1, 1), padding="SAME",
            dimension_numbers=("NCHW", "HWIO", "NCHW"),
            precision=lax.Precision.HIGHEST)
        return y + b.reshape(1, -1, 1, 1)

    y = stage(x_nchw, p["scale1"], p["shift1"], p["w1"], p["b1"])
    return stage(y, p["scale2"], p["shift2"], p["w2"], p["b2"])


if __name__ == "__main__":
    key = jax.random.PRNGKey(0)
    kx, kp = jax.random.split(key)

    N, Cin, H, W = 2, 4, 16, 16
    Cout = 8
    x = jax.random.normal(kx, (N, Cin, H, W), jnp.float32)       # NCHW, like PyTorch
    params = init_params(kp, in_channels=Cin, out_channels=Cout, kernel=3)

    ref = jax.block_until_ready(_reference_forward(x, params))

    # f32-operand path: bit-close validation against the f32 lax.conv reference.
    out = jax.block_until_ready(basic_conv_forward(x, params, use_bf16_matmul=False))
    assert out.shape == (N, Cout, H, W), out.shape
    assert jnp.allclose(out, ref, atol=1e-4, rtol=1e-4), float(jnp.max(jnp.abs(out - ref)))

    # bf16-MXU-operand path (perf configuration): f32 accumulate, looser tolerance.
    out_bf16 = jax.block_until_ready(basic_conv_forward(x, params, use_bf16_matmul=True))
    assert jnp.allclose(out_bf16, ref, atol=5e-2, rtol=5e-2), float(jnp.max(jnp.abs(out_bf16 - ref)))

    print("KERNEL_OK")
</pallas_src>

<mosaic_0001>
module attributes {stable_mosaic.version = 11 : i64} {
  func.func @_basic_conv_kernel(%arg0: i32, %arg1: memref<8x256xf32, #tpu.memory_space<vmem>>, %arg2: memref<9x256xf32, #tpu.memory_space<vmem>>, %arg3: memref<8x1xf32, #tpu.memory_space<vmem>>, %arg4: memref<8x1xf32, #tpu.memory_space<vmem>>, %arg5: memref<8x72xf32, #tpu.memory_space<vmem>>, %arg6: memref<8x1xf32, #tpu.memory_space<vmem>>, %arg7: memref<8x72xf32, #tpu.memory_space<vmem>>, %arg8: memref<8x1xf32, #tpu.memory_space<vmem>>, %arg9: memref<8x256xf32, #tpu.memory_space<vmem>>) attributes {dimension_semantics = [#tpu.dimension_semantics<parallel>], iteration_bounds = array<i64: 2>, scalar_prefetch = 0 : i64, scratch_operands = 0 : i64, tpu.core_type = #tpu.core_type<tc>, window_params = [{transform_indices = @transform_0, window_bounds = array<i64: 8, 256>}, {pipeline_mode = #tpu.pipeline_mode<synchronous>, transform_indices = @transform_1, window_bounds = array<i64: 9, 256>}, {pipeline_mode = #tpu.pipeline_mode<synchronous>, transform_indices = @transform_2, window_bounds = array<i64: 8, 1>}, {pipeline_mode = #tpu.pipeline_mode<synchronous>, transform_indices = @transform_3, window_bounds = array<i64: 8, 1>}, {pipeline_mode = #tpu.pipeline_mode<synchronous>, transform_indices = @transform_4, window_bounds = array<i64: 8, 72>}, {pipeline_mode = #tpu.pipeline_mode<synchronous>, transform_indices = @transform_5, window_bounds = array<i64: 8, 1>}, {pipeline_mode = #tpu.pipeline_mode<synchronous>, transform_indices = @transform_6, window_bounds = array<i64: 8, 72>}, {pipeline_mode = #tpu.pipeline_mode<synchronous>, transform_indices = @transform_7, window_bounds = array<i64: 8, 1>}, {transform_indices = @transform_8, window_bounds = array<i64: 8, 256>}]} {
    %c0 = arith.constant 0 : index
    %c0_0 = arith.constant 0 : index
    %0 = vector.load %arg2[%c0, %c0_0] : memref<9x256xf32, #tpu.memory_space<vmem>>, vector<9x256xf32>
    %c0_1 = arith.constant 0 : index
    %c0_2 = arith.constant 0 : index
    %1 = vector.load %arg1[%c0_1, %c0_2] : memref<8x256xf32, #tpu.memory_space<vmem>>, vector<8x256xf32>
    %c0_3 = arith.constant 0 : index
    %c0_4 = arith.constant 0 : index
    %2 = vector.load %arg3[%c0_3, %c0_4] : memref<8x1xf32, #tpu.memory_space<vmem>>, vector<8x1xf32>
    %3 = vector.broadcast %2 : vector<8x1xf32> to vector<8x256xf32>
    %4 = arith.mulf %1, %3 : vector<8x256xf32>
    %c0_5 = arith.constant 0 : index
    %c0_6 = arith.constant 0 : index
    %5 = vector.load %arg4[%c0_5, %c0_6] : memref<8x1xf32, #tpu.memory_space<vmem>>, vector<8x1xf32>
    %6 = vector.broadcast %5 : vector<8x1xf32> to vector<8x256xf32>
    %7 = arith.addf %4, %6 : vector<8x256xf32>
    %cst = arith.constant 0.000000e+00 : f32
    %8 = vector.broadcast %cst : f32 to vector<8x256xf32>
    %9 = arith.maximumf %7, %8 : vector<8x256xf32>
    %c0_7 = arith.constant 0 : index
    %c0_8 = arith.constant 0 : index
    %10 = vector.load %arg6[%c0_7, %c0_8] : memref<8x1xf32, #tpu.memory_space<vmem>>, vector<8x1xf32>
    %c0_9 = arith.constant 0 : index
    %c0_10 = arith.constant 0 : index
    %11 = vector.load %arg5[%c0_9, %c0_10] : memref<8x72xf32, #tpu.memory_space<vmem>>, vector<8x72xf32>
    %c17_i32 = arith.constant 17 : i32
    %12 = tpu.dynamic_rotate %9 by %c17_i32 dim 1 : vector<8x256xf32>, i32 -> vector<8x256xf32>
    %13 = vector.extract_strided_slice %0 {offsets = [0, 0], sizes = [1, 256], strides = [1, 1]} : vector<9x256xf32> to vector<1x256xf32>
    %14 = vector.broadcast %13 : vector<1x256xf32> to vector<8x256xf32>
    %15 = arith.mulf %12, %14 : vector<8x256xf32>
    %c16_i32 = arith.constant 16 : i32
    %16 = tpu.dynamic_rotate %9 by %c16_i32 dim 1 : vector<8x256xf32>, i32 -> vector<8x256xf32>
    %17 = vector.extract_strided_slice %0 {offsets = [1, 0], sizes = [1, 256], strides = [1, 1]} : vector<9x256xf32> to vector<1x256xf32>
    %18 = vector.broadcast %17 : vector<1x256xf32> to vector<8x256xf32>
    %19 = arith.mulf %16, %18 : vector<8x256xf32>
    %c15_i32 = arith.constant 15 : i32
    %20 = tpu.dynamic_rotate %9 by %c15_i32 dim 1 : vector<8x256xf32>, i32 -> vector<8x256xf32>
    %21 = vector.extract_strided_slice %0 {offsets = [2, 0], sizes = [1, 256], strides = [1, 1]} : vector<9x256xf32> to vector<1x256xf32>
    %22 = vector.broadcast %21 : vector<1x256xf32> to vector<8x256xf32>
    %23 = arith.mulf %20, %22 : vector<8x256xf32>
    %c1_i32 = arith.constant 1 : i32
    %24 = tpu.dynamic_rotate %9 by %c1_i32 dim 1 : vector<8x256xf32>, i32 -> vector<8x256xf32>
    %25 = vector.extract_strided_slice %0 {offsets = [3, 0], sizes = [1, 256], strides = [1, 1]} : vector<9x256xf32> to vector<1x256xf32>
    %26 = vector.broadcast %25 : vector<1x256xf32> to vector<8x256xf32>
    %27 = arith.mulf %24, %26 : vector<8x256xf32>
    %c255_i32 = arith.constant 255 : i32
    %28 = tpu.dynamic_rotate %9 by %c255_i32 dim 1 : vector<8x256xf32>, i32 -> vector<8x256xf32>
    %29 = vector.extract_strided_slice %0 {offsets = [5, 0], sizes = [1, 256], strides = [1, 1]} : vector<9x256xf32> to vector<1x256xf32>
    %30 = vector.broadcast %29 : vector<1x256xf32> to vector<8x256xf32>
    %31 = arith.mulf %28, %30 : vector<8x256xf32>
    %c241_i32 = arith.constant 241 : i32
    %32 = tpu.dynamic_rotate %9 by %c241_i32 dim 1 : vector<8x256xf32>, i32 -> vector<8x256xf32>
    %33 = vector.extract_strided_slice %0 {offsets = [6, 0], sizes = [1, 256], strides = [1, 1]} : vector<9x256xf32> to vector<1x256xf32>
    %34 = vector.broadcast %33 : vector<1x256xf32> to vector<8x256xf32>
    %35 = arith.mulf %32, %34 : vector<8x256xf32>
    %c240_i32 = arith.constant 240 : i32
    %36 = tpu.dynamic_rotate %9 by %c240_i32 dim 1 : vector<8x256xf32>, i32 -> vector<8x256xf32>
    %37 = vector.extract_strided_slice %0 {offsets = [7, 0], sizes = [1, 256], strides = [1, 1]} : vector<9x256xf32> to vector<1x256xf32>
    %38 = vector.broadcast %37 : vector<1x256xf32> to vector<8x256xf32>
    %39 = arith.mulf %36, %38 : vector<8x256xf32>
    %c239_i32 = arith.constant 239 : i32
    %40 = tpu.dynamic_rotate %9 by %c239_i32 dim 1 : vector<8x256xf32>, i32 -> vector<8x256xf32>
    %41 = vector.extract_strided_slice %0 {offsets = [8, 0], sizes = [1, 256], strides = [1, 1]} : vector<9x256xf32> to vector<1x256xf32>
    %42 = vector.broadcast %41 : vector<1x256xf32> to vector<8x256xf32>
    %43 = arith.mulf %40, %42 : vector<8x256xf32>
    %44 = tpu.concatenate %15, %19, %23, %27, %9, %31, %35, %39, %43 in 0 : vector<8x256xf32>, vector<8x256xf32>, vector<8x256xf32>, vector<8x256xf32>, vector<8x256xf32>, vector<8x256xf32>, vector<8x256xf32>, vector<8x256xf32>, vector<8x256xf32> -> vector<72x256xf32>
    %cst_11 = arith.constant dense<0.000000e+00> : vector<8x256xf32>
    %45 = tpu.matmul %11, %44, %cst_11 {dimension_numbers = #tpu.dot_dimension_numbers<[1], [0], [0], [1], [0, 0, 1, 1], [], []>} : vector<8x72xf32>, vector<72x256xf32>, vector<8x256xf32> -> vector<8x256xf32>
    %46 = vector.broadcast %10 : vector<8x1xf32> to vector<8x256xf32>
    %47 = arith.addf %45, %46 : vector<8x256xf32>
    %cst_12 = arith.constant 0.000000e+00 : f32
    %48 = vector.broadcast %cst_12 : f32 to vector<8x256xf32>
    %49 = arith.maximumf %47, %48 : vector<8x256xf32>
    %c0_13 = arith.constant 0 : index
    %c0_14 = arith.constant 0 : index
    %50 = vector.load %arg8[%c0_13, %c0_14] : memref<8x1xf32, #tpu.memory_space<vmem>>, vector<8x1xf32>
    %c0_15 = arith.constant 0 : index
    %c0_16 = arith.constant 0 : index
    %51 = vector.load %arg7[%c0_15, %c0_16] : memref<8x72xf32, #tpu.memory_space<vmem>>, vector<8x72xf32>
    %c17_i32_17 = arith.constant 17 : i32
    %52 = tpu.dynamic_rotate %49 by %c17_i32_17 dim 1 : vector<8x256xf32>, i32 -> vector<8x256xf32>
    %53 = vector.extract_strided_slice %0 {offsets = [0, 0], sizes = [1, 256], strides = [1, 1]} : vector<9x256xf32> to vector<1x256xf32>
    %54 = vector.broadcast %53 : vector<1x256xf32> to vector<8x256xf32>
    %55 = arith.mulf %52, %54 : vector<8x256xf32>
    %c16_i32_18 = arith.constant 16 : i32
    %56 = tpu.dynamic_rotate %49 by %c16_i32_18 dim 1 : vector<8x256xf32>, i32 -> vector<8x256xf32>
    %57 = vector.extract_strided_slice %0 {offsets = [1, 0], sizes = [1, 256], strides = [1, 1]} : vector<9x256xf32> to vector<1x256xf32>
    %58 = vector.broadcast %57 : vector<1x256xf32> to vector<8x256xf32>
    %59 = arith.mulf %56, %58 : vector<8x256xf32>
    %c15_i32_19 = arith.constant 15 : i32
    %60 = tpu.dynamic_rotate %49 by %c15_i32_19 dim 1 : vector<8x256xf32>, i32 -> vector<8x256xf32>
    %61 = vector.extract_strided_slice %0 {offsets = [2, 0], sizes = [1, 256], strides = [1, 1]} : vector<9x256xf32> to vector<1x256xf32>
    %62 = vector.broadcast %61 : vector<1x256xf32> to vector<8x256xf32>
    %63 = arith.mulf %60, %62 : vector<8x256xf32>
    %c1_i32_20 = arith.constant 1 : i32
    %64 = tpu.dynamic_rotate %49 by %c1_i32_20 dim 1 : vector<8x256xf32>, i32 -> vector<8x256xf32>
    %65 = vector.extract_strided_slice %0 {offsets = [3, 0], sizes = [1, 256], strides = [1, 1]} : vector<9x256xf32> to vector<1x256xf32>
    %66 = vector.broadcast %65 : vector<1x256xf32> to vector<8x256xf32>
    %67 = arith.mulf %64, %66 : vector<8x256xf32>
    %c255_i32_21 = arith.constant 255 : i32
    %68 = tpu.dynamic_rotate %49 by %c255_i32_21 dim 1 : vector<8x256xf32>, i32 -> vector<8x256xf32>
    %69 = vector.extract_strided_slice %0 {offsets = [5, 0], sizes = [1, 256], strides = [1, 1]} : vector<9x256xf32> to vector<1x256xf32>
    %70 = vector.broadcast %69 : vector<1x256xf32> to vector<8x256xf32>
    %71 = arith.mulf %68, %70 : vector<8x256xf32>
    %c241_i32_22 = arith.constant 241 : i32
    %72 = tpu.dynamic_rotate %49 by %c241_i32_22 dim 1 : vector<8x256xf32>, i32 -> vector<8x256xf32>
    %73 = vector.extract_strided_slice %0 {offsets = [6, 0], sizes = [1, 256], strides = [1, 1]} : vector<9x256xf32> to vector<1x256xf32>
    %74 = vector.broadcast %73 : vector<1x256xf32> to vector<8x256xf32>
    %75 = arith.mulf %72, %74 : vector<8x256xf32>
    %c240_i32_23 = arith.constant 240 : i32
    %76 = tpu.dynamic_rotate %49 by %c240_i32_23 dim 1 : vector<8x256xf32>, i32 -> vector<8x256xf32>
    %77 = vector.extract_strided_slice %0 {offsets = [7, 0], sizes = [1, 256], strides = [1, 1]} : vector<9x256xf32> to vector<1x256xf32>
    %78 = vector.broadcast %77 : vector<1x256xf32> to vector<8x256xf32>
    %79 = arith.mulf %76, %78 : vector<8x256xf32>
    %c239_i32_24 = arith.constant 239 : i32
    %80 = tpu.dynamic_rotate %49 by %c239_i32_24 dim 1 : vector<8x256xf32>, i32 -> vector<8x256xf32>
    %81 = vector.extract_strided_slice %0 {offsets = [8, 0], sizes = [1, 256], strides = [1, 1]} : vector<9x256xf32> to vector<1x256xf32>
    %82 = vector.broadcast %81 : vector<1x256xf32> to vector<8x256xf32>
    %83 = arith.mulf %80, %82 : vector<8x256xf32>
    %84 = tpu.concatenate %55, %59, %63, %67, %49, %71, %75, %79, %83 in 0 : vector<8x256xf32>, vector<8x256xf32>, vector<8x256xf32>, vector<8x256xf32>, vector<8x256xf32>, vector<8x256xf32>, vector<8x256xf32>, vector<8x256xf32>, vector<8x256xf32> -> vector<72x256xf32>
    %cst_25 = arith.constant dense<0.000000e+00> : vector<8x256xf32>
    %85 = tpu.matmul %51, %84, %cst_25 {dimension_numbers = #tpu.dot_dimension_numbers<[1], [0], [0], [1], [0, 0, 1, 1], [], []>} : vector<8x72xf32>, vector<72x256xf32>, vector<8x256xf32> -> vector<8x256xf32>
    %86 = vector.broadcast %50 : vector<8x1xf32> to vector<8x256xf32>
    %87 = arith.addf %85, %86 : vector<8x256xf32>
    %c0_26 = arith.constant 0 : index
    %c0_27 = arith.constant 0 : index
    %88 = vector.load %arg9[%c0_26, %c0_27] : memref<8x256xf32, #tpu.memory_space<vmem>>, vector<8x256xf32>
    tpu.vector_store %arg9[%c0_26, %c0_27], %87 {strides = array<i32>} : memref<8x256xf32, #tpu.memory_space<vmem>>, vector<8x256xf32>,
    return
  }
  func.func @transform_0(%arg0: i32) -> (i32, i32) {
    %c0_i32 = arith.constant 0 : i32
    %c0_i32_0 = arith.constant 0 : i32
    return %c0_i32, %arg0 : i32, i32
  }
  func.func @transform_1(%arg0: i32) -> (i32, i32) {
    %c0_i32 = arith.constant 0 : i32
    %c0_i32_0 = arith.constant 0 : i32
    %c0_i32_1 = arith.constant 0 : i32
    return %c0_i32, %c0_i32_0 : i32, i32
  }
  func.func @transform_2(%arg0: i32) -> (i32, i32) {
    %c0_i32 = arith.constant 0 : i32
    %c0_i32_0 = arith.constant 0 : i32
    %c0_i32_1 = arith.constant 0 : i32
    return %c0_i32, %c0_i32_0 : i32, i32
  }
  func.func @transform_3(%arg0: i32) -> (i32, i32) {
    %c0_i32 = arith.constant 0 : i32
    %c0_i32_0 = arith.constant 0 : i32
    %c0_i32_1 = arith.constant 0 : i32
    return %c0_i32, %c0_i32_0 : i32, i32
  }
  func.func @transform_4(%arg0: i32) -> (i32, i32) {
    %c0_i32 = arith.constant 0 : i32
    %c0_i32_0 = arith.constant 0 : i32
    %c0_i32_1 = arith.constant 0 : i32
    return %c0_i32, %c0_i32_0 : i32, i32
  }
  func.func @transform_5(%arg0: i32) -> (i32, i32) {
    %c0_i32 = arith.constant 0 : i32
    %c0_i32_0 = arith.constant 0 : i32
    %c0_i32_1 = arith.constant 0 : i32
    return %c0_i32, %c0_i32_0 : i32, i32
  }
  func.func @transform_6(%arg0: i32) -> (i32, i32) {
    %c0_i32 = arith.constant 0 : i32
    %c0_i32_0 = arith.constant 0 : i32
    %c0_i32_1 = arith.constant 0 : i32
    return %c0_i32, %c0_i32_0 : i32, i32
  }
  func.func @transform_7(%arg0: i32) -> (i32, i32) {
    %c0_i32 = arith.constant 0 : i32
    %c0_i32_0 = arith.constant 0 : i32
    %c0_i32_1 = arith.constant 0 : i32
    return %c0_i32, %c0_i32_0 : i32, i32
  }
  func.func @transform_8(%arg0: i32) -> (i32, i32) {
    %c0_i32 = arith.constant 0 : i32
    %c0_i32_0 = arith.constant 0 : i32
    return %c0_i32, %arg0 : i32, i32
  }
}

</mosaic_0001>

<bundles_post_ra>
// kernel: tpu_custom_call.1
= control target key start
LH: loop header
LB: loop body
LE: loop exit
PB: predicated region body
PF: predicated region fallthrough
CT: control target
= control target key end

     0   :  { %13 = vsyncpa [#allocation3], 0  ;;  %s1455_s0 = inlined_call_operand.vmem [shape: f32[8,512], index: 0, kind: input, shape index: {}]   ;;  %s1456_s1 = inlined_call_operand.hbm [shape: f32[9,256], index: 1, kind: input, shape index: {}]   ;;  %s1457_s2 = inlined_call_operand.vmem [shape: f32[8,1], index: 2, kind: input, shape index: {}]   ;;  %s1458_s3 = inlined_call_operand.vmem [shape: f32[8,1], index: 3, kind: input, shape index: {}]   ;;  %s1459_s4 = inlined_call_operand.vmem [shape: f32[8,72], index: 4, kind: input, shape index: {}]   ;;  %s1460_s5 = inlined_call_operand.vmem [shape: f32[8,1], index: 5, kind: input, shape index: {}]   ;;  %s1461_s6 = inlined_call_operand.vmem [shape: f32[8,72], index: 6, kind: input, shape index: {}]   ;;  %s1462_s7 = inlined_call_operand.vmem [shape: f32[8,1], index: 7, kind: input, shape index: {}]   ;;  %s1463_s8 = inlined_call_operand.hbm [shape: f32[8,512], index: 8, kind: output, shape index: {}]  }
   0x1   :  { %14 = vsyncpa [#allocation4], 0 }
   0x2   :  { %16 = vsyncpa [#allocation4 + $0x1], 0  ;;  %s1071_s27 = smov 0   ;;  %s1073_s28 = smov 0  }
   0x3   :  { %s1075_s29 = smov 0   ;;  %s1077_s30 = smov 0  }
   0x4 LB: > { %s1092_s9 = sadd.s32 4294967295, %s1010_s30   ;;  %s801_s10 = sadd.s32 4294967294, %s1010_s30   ;;  %s1010_s30 = sphi %s1077_s30, %s1479_s30   ;;  %s1006_s29 = sphi %s1075_s29, %s1478_s29   ;;  %s1002_s28 = sphi %s1073_s28, %s1477_s28   ;;  %s998_s27 = sphi %s1071_s27, %s1476_s27  }
   0x5   : > { %s1096_s11 = sadd.s32 1, %s1010_s30   ;;  %s202_s12 = sadd.s32 1, %s1006_s29 }
   0x6   : > { %s199_s13 = ssub.s32 %s1010_s30, %s1096_s11  ;;  %p212_p0 = scmp.ne.s32.totalorder %s1006_s29, %s1002_s28 }
   0x7   : > { %p200_p1 = scmp.eq.s32.totalorder %s199_s13, 0  ;;  %p213_p2 = scmp.eq.s32.totalorder %s1092_s9, 1 }
   0x8   : > { %p218_p3 = scmp.ne.s32.totalorder %s1002_s28, %s998_s27  ;;  %p219_p4 = scmp.eq.s32.totalorder %s801_s10, 1 }
   0x9   : > { %s1107_s14 = scalar_select %p200_p1, %s1006_s29, %s202_s12  }
   0xa   : > { %p1109_p5 = por %p213_p2, %p212_p0  ;;  %p1113_p6 = por %p219_p4, %p218_p3 }
   0xb   : > { %p802_p7 = scmp.ge.s32.totalorder %s1010_s30, 1  ;;  %p226_p8 = scmp.lt.s32.totalorder %s1010_s30, 3 }
   0xc   : > { %s1467_s15 = scalar_select %p1109_p5, 1, 0 }
   0xd   : > { %s1468_s16 = scalar_select %p1113_p6, 1, 0 }
   0xe   : > { %p1464_p9 = scmp.eq.s32.totalorder %s1092_s9, 0  ;;  %p1120_p10 = pnand %p802_p7, %p226_p8 }
   0xf   : > { %s1012_s18 = smov [#allocation2]   ;;  %s916_s23 = scalar_lea.hbm %s1456_s1, 512 }
  0x10   : > { %s1469_s17 = scalar_select %p1120_p10, 1, 0 }
  0x11   : > { %s238_s19 = sshll.u32 %s1012_s18, 4  ;;  %p858_p11 = pneg %p1120_p10  ;;  %s239_s19 = int_to_ptr.vmem [resolvable:$true] %s238_s19 }
  0x12   : > { %p917_p13 = scmp.ne.s32.totalorder %s1456_s1, %s916_s23  ;;  %p923_p3 = scmp.lt.u32.totalorder %s916_s23, %s1456_s1 }
  0x13   : > { %p1128_p12 = pnand %p1464_p9, %p858_p11 }
  0x15   : > { %p918_p0 = pneg %p1128_p12 }
  0x17   : > { %p919_p1 = pnand %p918_p0, %p917_p13 }
  0x19   : > { %p920_p2 = pneg %p919_p1 }
  0x1b   : > { %p925_p4 = pnand %p923_p3, %p920_p2 }
  0x1d   : > { %928 = shalt.err (!%p925_p4)
}
  0x1e   : > { %s929_s12 = scalar_lea.vmem %s239_s19, 512  ;;  %p937_p9 = scmp.lt.s32.totalorder %s239_s19, %s239_s19 }
  0x1f   : > { %p930_p7 = scmp.ne.s32.totalorder %s239_s19, %s929_s12  ;;  %p938_p6 = scmp.lt.s32.totalorder %s929_s12, %s929_s12 }
  0x21   : > { %p932_p8 = pnand %p930_p7, %p918_p0  ;;  %p939_p5 = por %p938_p6, %p937_p9 }
  0x23   : > { %p933_p11 = pneg %p932_p8 }
  0x25   : > { %p940_p10 = pnand %p939_p5, %p933_p11 }
  0x27   : > { %943 = shalt.err (!%p940_p10)
}
  0x28   : > { %s1013_s13 = smov 256   ;;  %s1014_s18 = smov 16  }
  0x29   : > { %861 = dma.hbm_to_vmem [thread:$0]  (!%p1128_p12), %s1456_s1, 512, %s239_s19, [#allocation3], %s1013_s13, %s1013_s13, %s1014_s18  }
  0x2a   : > { %p1471_p13 = scmp.ne.s32.totalorder %s1469_s17, 0 }
  0x2b   : > { %p1472_p1 = scmp.eq.s32.totalorder (!%p1471_p13), %s1092_s9, 0 }
  0x2c   : > { %281 = sbr.rel (%p1471_p13) target bundleno = 940 (0x3ac), region = 52 }
  0x33   : > { %989 = dma.done.wait (%p1472_p1), [#allocation3], 512   ;;  %p1473_p0 = pmov %p1472_p1 }
  0x34   : > { %v1015_v0 = vmov 0   ;;  %v328_v1 = vld [vmem:[%s1457_s2] sm:$0xff]  ;;  %s808_s17 = sshll.u32 %s1092_s9, 1  ;;  %s1016_s13 = smov 16   ;;  %v1024_v14 = vmov 0.0   ;;  %v352_v15 = vlaneseq  ;;  %v1211_v23 = vld [vmem:[#allocation2 + $0x8] sm:$0xff] }
  0x35   : > { %991 = vsyncadd (%p1473_p0), [#allocation3], 4294966784  ;;  %914 = vset.pattern.permute.xlu0 %v1015_v0  ;;  %915 = vset.pattern.permute.xlu1 %v1015_v0  ;;  %v336_v2 = vld [vmem:[%s1458_s3] sm:$0xff]  ;;  %p316_p5 = scmp.lt.s32.totalorder %s808_s17, 3  ;;  %s1017_s18 = smov 17   ;;  %vm491_vm8 = vcmask 588800  }
  0x36   : > { %331 = vperm.xlu0 %914, %v328_v1   ;;  %s1018_s21 = smov 15   ;;  %s1019_s22 = smov 1   ;;  %v346_v13 = vld [vmem:[%s1460_s5] sm:$0xff]  ;;  %559 = vmatprep.mubr.f32.mxu0 %v1024_v14  ;;  %v1203_v16 = vshrl.u32 %v352_v15, 7  ;;  %v1205_v19 = vand.u32 127, %v352_v15 }
  0x37   : > { %s1481_s17 = smov (!%p316_p5, %s808_s17), 3  ;;  %s1020_s23 = smov 127   ;;  %706 = vmatprep.mubr.f32.mxu1 %v1024_v14  ;;  %v1208_v21 = vld [vmem:[#allocation2] sm:$0xff] }
  0x38   : > { %s809_s25 = sshll.u32 %s1481_s17, 3  ;;  %s1021_s24 = smov 113   ;;  %v359_v20 = vsub.s32 0, %v1203_v16  ;;  %v376_v22 = vsub.s32 1, %v1203_v16  ;;  %vm354_vm0 = vcmp.lt.s32.totalorder %v1205_v19, 17  ;;  %vm371_vm1 = vcmp.lt.s32.totalorder %v1205_v19, 16 }
  0x39   : > { %s319_s12 = scalar_lea.vmem %s1455_s0, %s809_s25  ;;  %s1022_s20 = smov 112   ;;  %v393_v36 = vsub.s32 2, %v1203_v16  ;;  %v410_v37 = vsub.s32 3, %v1203_v16  ;;  %vm388_vm2 = vcmp.lt.s32.totalorder %v1205_v19, 15  ;;  %v427_v46 = vsub.s32 5, %v1203_v16 }
  0x3a   : > { %339 = vperm.xlu0 %914, %v336_v2   ;;  %v326_v4 = vld [vmem:[%s319_s12] sm:$0xff]  ;;  %v327_v5 = vld [vmem:[%s319_s12 + $0x8] sm:$0xff]  ;;  %s1023_s19 = smov 111   ;;  %v1215_v26 = vrot.slane %v1208_v21, %v359_v20  ;;  %v1219_v27 = vrot.slane %v1208_v21, %v376_v22  ;;  %v1222_v28 = vrot.slane %v1211_v23, %v359_v20  ;;  %v1225_v29 = vrot.slane %v1211_v23, %v376_v22  ;;  %p1474_p9 = scmp.ne.s32.totalorder %s1467_s15, 0 }
  0x3b   : > { %v1243_v45 = vrot.slane %v1208_v21, %v393_v36  ;;  %v1247_v48 = vrot.slane %v1211_v23, %v393_v36  ;;  %vm405_vm3 = vcmp.lt.s32.totalorder %v1205_v19, 1  ;;  %v1251_v49 = vrot.slane %v1208_v21, %v410_v37  ;;  %v1316_v36 = vld [vmem:[#allocation2 + $0x10] ss:$0 sm:$0xff]  ;;  %s1025_s12 = smov [#allocation5]  }
  0x3c   : > { %v1254_v50 = vrot.slane %v1211_v23, %v410_v37  ;;  %vm422_vm4 = vcmp.lt.s32.totalorder %v1205_v19, 127  ;;  %v1266_v56 = vrot.slane %v1208_v21, %v427_v46  ;;  %v1269_v57 = vrot.slane %v1211_v23, %v427_v46 }
  0x3d   : > { %vm439_vm5 = vcmp.lt.s32.totalorder %v1205_v19, 113  ;;  %vm456_vm6 = vcmp.lt.s32.totalorder %v1205_v19, 112  ;;  %vm473_vm7 = vcmp.lt.s32.totalorder %v1205_v19, 111 }
  0xb5   : > { %v332_v3 = vpop.permute.xlu0 %331 }
  0xb6   : > { %v334_v6 = vmul.f32 %v332_v3, %v326_v4  ;;  %v335_v8 = vmul.f32 %v332_v3, %v327_v5  ;;  %v444_v4 = vsub.s32 6, %v1203_v16 }
  0xb8   : > { %v1290_v15 = vrot.slane %v1211_v23, %v444_v4 }
  0xb9   : > { %v340_v7 = vpop.permute.xlu0 %339 }
  0xba   : > { %v342_v9 = vadd.f32 %v340_v7, %v334_v6  ;;  %v343_v10 = vadd.f32 %v340_v7, %v335_v8  ;;  %v461_v7 = vsub.s32 7, %v1203_v16 }
  0xbc   : > { %v1164_v11 = vmax.f32 %v342_v9, 0.0  ;;  %v1170_v12 = vmax.f32 %v343_v10, 0.0  ;;  %v1294_v16 = vrot.slane %v1208_v21, %v461_v7 }
  0xbe   : > { %367 = vrot.lane.b32.xlu0 %v1164_v11, %s1016_s13  ;;  %348 = vrot.lane.b32.xlu1 %v1164_v11, %s1017_s18 }
  0xc2   : > { %384 = vrot.lane.b32.xlu0 %v1164_v11, %s1018_s21  ;;  %350 = vrot.lane.b32.xlu1 %v1170_v12, %s1017_s18 }
  0xc6   : > { %401 = vrot.lane.b32.xlu0 %v1164_v11, %s1019_s22  ;;  %369 = vrot.lane.b32.xlu1 %v1170_v12, %s1016_s13 }
  0xca   : > { %418 = vrot.lane.b32.xlu0 %v1164_v11, %s1020_s23  ;;  %386 = vrot.lane.b32.xlu1 %v1170_v12, %s1018_s21 }
  0xce   : > { %435 = vrot.lane.b32.xlu0 %v1164_v11, %s1021_s24  ;;  %403 = vrot.lane.b32.xlu1 %v1170_v12, %s1019_s22 }
  0xd2   : > { %452 = vrot.lane.b32.xlu0 %v1164_v11, %s1022_s20  ;;  %420 = vrot.lane.b32.xlu1 %v1170_v12, %s1020_s23 }
  0xd6   : > { %469 = vrot.lane.b32.xlu0 %v1164_v11, %s1023_s19  ;;  %437 = vrot.lane.b32.xlu1 %v1170_v12, %s1021_s24 }
  0xda   : > { %488 = vperm.xlu0 %914, %v346_v13   ;;  %454 = vrot.lane.b32.xlu1 %v1170_v12, %s1022_s20  ;;  %v1287_v13 = vrot.slane %v1208_v21, %v444_v4 }
  0xde   : > { %471 = vrot.lane.b32.xlu1 %v1170_v12, %s1023_s19 }
 0x130   : > { %v368_v17 = vpop.permute.xlu0 %367  ;;  %v349_v18 = vpop.permute.xlu1 %348 }
 0x134   : > { %v385_v24 = vpop.permute.xlu0 %384  ;;  %v351_v25 = vpop.permute.xlu1 %350 }
 0x135   : > { %v355_v30 = vsel %vm354_vm0, %v349_v18, %v351_v25  ;;  %v356_v31 = vsel %vm354_vm0, %v351_v25, %v349_v18 }
 0x136   : > { %v365_v38 = vmul.f32 %v1215_v26, %v356_v31  ;;  %v366_v40 = vmul.f32 %v1222_v28, %v355_v30  ;;  %v1312_v30 = vld [vmem:[#allocation2 + $0x18] ss:$0 sm:$0xff] }
 0x138   : > { %v402_v32 = vpop.permute.xlu0 %401  ;;  %v370_v33 = vpop.permute.xlu1 %369 }
 0x139   : > { %v372_v34 = vsel %vm371_vm1, %v368_v17, %v370_v33  ;;  %v373_v35 = vsel %vm371_vm1, %v370_v33, %v368_v17  ;;  %v1297_v17 = vrot.slane %v1211_v23, %v461_v7 }
 0x13a   : > { %v382_v39 = vmul.f32 %v1219_v27, %v373_v35  ;;  %v383_v41 = vmul.f32 %v1225_v29, %v372_v34 }
 0x13c   : > { %v387_v42 = vpop.permute.xlu1 %386  ;;  %v820_v43 = vpack.c.bf16 %v383_v41, %v366_v40  ;;  %v822_v44 = vpack.c.bf16 %v382_v39, %v365_v38  ;;  %v419_v47 = vpop.permute.xlu0 %418  ;;  %v347_v40 = vld [vmem:[%s1459_s4] sm:$0xff] }
 0x13d   : > { %v389_v51 = vsel %vm388_vm2, %v385_v24, %v387_v42  ;;  %v390_v52 = vsel %vm388_vm2, %v387_v42, %v385_v24 }
 0x13e   : > { %821 = vmatprep.subr.bf16.mxu0 %v820_v43  ;;  %v399_v58 = vmul.f32 %v1243_v45, %v390_v52  ;;  %v400_v59 = vmul.f32 %v1247_v48, %v389_v51  ;;  %v568_v52 = vld [vmem:[%s1462_s7] sm:$0xff] }
 0x13f   : > { %823 = vmatpush1.bf16.msra.mxu0 %v822_v44 }
 0x140   : > { %v404_v53 = vpop.permute.xlu1 %403  ;;  %v436_v62 = vpop.permute.xlu0 %435 }
 0x141   : > { %v406_v54 = vsel %vm405_vm3, %v402_v32, %v404_v53  ;;  %v407_v55 = vsel %vm405_vm3, %v404_v53, %v402_v32 }
 0x142   : > { %v416_v60 = vmul.f32 %v1251_v49, %v407_v55  ;;  %v417_v61 = vmul.f32 %v1254_v50, %v406_v54 }
 0x144   : > { %v421_v63 = vpop.permute.xlu1 %420  ;;  %v824_v0 = vpack.c.bf16 %v417_v61, %v400_v59  ;;  %v826_v1 = vpack.c.bf16 %v416_v60, %v399_v58  ;;  %v453_v14 = vpop.permute.xlu0 %452 }
 0x145   : > { %v423_v2 = vsel %vm422_vm4, %v419_v47, %v421_v63  ;;  %v424_v3 = vsel %vm422_vm4, %v421_v63, %v419_v47 }
 0x146   : > { %v433_v5 = vmul.f32 %v1266_v56, %v423_v2  ;;  %v434_v6 = vmul.f32 %v1269_v57, %v424_v3  ;;  %825 = vmatprep.subr.bf16.mxu0 %v824_v0 }
 0x147   : > { %827 = vmatpush1.bf16.msra.mxu0 %v826_v1 }
 0x148   : > { %v438_v8 = vpop.permute.xlu1 %437  ;;  %v828_v9 = vpack.c.bf16 %v434_v6, %v1170_v12  ;;  %v830_v10 = vpack.c.bf16 %v433_v5, %v1164_v11  ;;  %v470_v31 = vpop.permute.xlu0 %469 }
 0x149   : > { %v440_v12 = vsel %vm439_vm5, %v436_v62, %v438_v8  ;;  %v441_v11 = vsel %vm439_vm5, %v438_v8, %v436_v62 }
 0x14a   : > { %829 = vmatprep.subr.bf16.mxu0 %v828_v9  ;;  %v450_v21 = vmul.f32 %v1287_v13, %v440_v12  ;;  %v451_v23 = vmul.f32 %v1290_v15, %v441_v11 }
 0x14b   : > { %831 = vmatpush1.bf16.msra.mxu0 %v830_v10 }
 0x14c   : > { %v455_v18 = vpop.permute.xlu1 %454 }
 0x14d   : > { %v457_v20 = vsel %vm456_vm6, %v453_v14, %v455_v18  ;;  %v458_v22 = vsel %vm456_vm6, %v455_v18, %v453_v14 }
 0x14e   : > { %v467_v24 = vmul.f32 %v1294_v16, %v457_v20  ;;  %v468_v25 = vmul.f32 %v1297_v17, %v458_v22 }
 0x150   : > { %v472_v32 = vpop.permute.xlu1 %471  ;;  %v832_v33 = vpack.c.bf16 %v468_v25, %v451_v23  ;;  %v834_v34 = vpack.c.bf16 %v467_v24, %v450_v21 }
 0x151   : > { %v475_v35 = vsel %vm473_vm7, %v472_v32, %v470_v31  ;;  %v474_v37 = vsel %vm473_vm7, %v470_v31, %v472_v32 }
 0x152   : > { %v485_v38 = vmul.f32 %v1312_v30, %v475_v35  ;;  %833 = vmatprep.subr.bf16.mxu0 %v832_v33  ;;  %v484_v39 = vmul.f32 %v1316_v36, %v474_v37 }
 0x153   : > { %835 = vmatpush1.bf16.msra.mxu0 %v834_v34 }
 0x154   : > { %511 = vmatprep.subr.mxu0 %v485_v38 }
 0x157   : > { %512 = vmatpush1.msra.mxu0 %v484_v39 }
 0x158   : > { %812 = vmatmul.mubr.msk.f32.vlgmr.msra.gmra.mrb[0].mxu0 %vm491_vm8, %v347_v40 }
 0x159   : > { %v489_v41 = vpop.permute.xlu0 %488 }
 0x22b   : > { %v561_v42 = vpop.f32.mrb[0].mxu0 }
 0x22c   : > { %v562_v43 = vadd.f32 %v561_v42, %v489_v41  ;;  %v563_v44 = vpop.f32.mrb[1].mxu0 }
 0x22d   : > { %v564_v46 = vadd.f32 %v563_v44, %v489_v41 }
 0x22e   : > { %v1326_v47 = vmax.f32 %v562_v43, 0.0 }
 0x22f   : > { %v567_v51 = vmax.f32 %v564_v46, 0.0 }
 0x230   : > { %570 = vrot.lane.b32.xlu1 %v1326_v47, %s1017_s18 }
 0x231   : > { %572 = vrot.lane.b32.xlu0 %v567_v51, %s1017_s18 }
 0x234   : > { %578 = vrot.lane.b32.xlu1 %v1326_v47, %s1016_s13 }
 0x235   : > { %580 = vrot.lane.b32.xlu0 %v567_v51, %s1016_s13  ;;  %s948_s13 = sshll.u32 %s1025_s12, 4  ;;  %s949_s13 = int_to_ptr.vmem [resolvable:$false] %s948_s13 }
 0x236   : > { %s950_s18 = scalar_lea.vmem %s949_s13, 512 }
 0x238   : > { %586 = vrot.lane.b32.xlu1 %v1326_v47, %s1018_s21 }
 0x239   : > { %588 = vrot.lane.b32.xlu0 %v567_v51, %s1018_s21 }
 0x23c   : > { %594 = vrot.lane.b32.xlu1 %v1326_v47, %s1019_s22 }
 0x23d   : > { %596 = vrot.lane.b32.xlu0 %v567_v51, %s1019_s22  ;;  %s312_s22 = sand.u32 1, %s1002_s28  }
 0x23e   : > { %s716_s10 = scalar_lea.sflag [#allocation4], %s312_s22 }
 0x240   : > { %602 = vrot.lane.b32.xlu1 %v1326_v47, %s1020_s23 }
 0x241   : > { %604 = vrot.lane.b32.xlu0 %v567_v51, %s1020_s23  ;;  %s807_s23 = sshll.u32 %s312_s22, 4 }
 0x244   : > { %610 = vrot.lane.b32.xlu1 %v1326_v47, %s1021_s24 }
 0x245   : > { %612 = vrot.lane.b32.xlu0 %v567_v51, %s1021_s24  ;;  %s819_s24 = sshll.u32 %s1092_s9, 8 }
 0x246   : > { %s1413_s26 = scalar_lea.hbm %s1463_s8, %s819_s24 }
 0x248   : > { %618 = vrot.lane.b32.xlu1 %v1326_v47, %s1022_s20 }
 0x249   : > { %620 = vrot.lane.b32.xlu0 %v567_v51, %s1022_s20  ;;  %s314_s20 = scalar_lea.vmem [#allocation5], %s807_s23 }
 0x24c   : > { %626 = vrot.lane.b32.xlu1 %v1326_v47, %s1023_s19 }
 0x24d   : > { %628 = vrot.lane.b32.xlu0 %v567_v51, %s1023_s19  ;;  %s730_s19 = sshll.u32 %s314_s20, 4  ;;  %s1415_s19 = int_to_ptr.vmem [resolvable:$true] %s730_s19 }
 0x24e   : > { %s944_s9 = scalar_lea.vmem %s1415_s19, 256  ;;  %p951_p2 = scmp.lt.s32.totalorder %s1415_s19, %s949_s13 }
 0x24f   : > { %p945_p6 = scmp.ne.s32.totalorder %s1415_s19, %s944_s9  ;;  %p952_p3 = scmp.lt.s32.totalorder %s950_s18, %s944_s9 }
 0x250   : > { %636 = vperm.xlu1 %915, %v568_v52  }
 0x251   : > { %p946_p10 = pnand %p945_p6, %p1474_p9  ;;  %p953_p4 = por %p952_p3, %p951_p2 }
 0x253   : > { %p947_p12 = pneg %p946_p10 }
 0x255   : > { %p954_p7 = pnand %p953_p4, %p947_p12 }
 0x2a2   : > { %v571_v53 = vpop.permute.xlu1 %570 }
 0x2a3   : > { %v573_v54 = vpop.permute.xlu0 %572 }
 0x2a4   : > { %v574_v55 = vsel %vm354_vm0, %v571_v53, %v573_v54  ;;  %v575_v58 = vsel %vm354_vm0, %v573_v54, %v571_v53 }
 0x2a5   : > { %v576_v63 = vmul.f32 %v575_v58, %v1215_v26  ;;  %v577_v1 = vmul.f32 %v574_v55, %v1222_v28 }
 0x2a6   : > { %v579_v59 = vpop.permute.xlu1 %578 }
 0x2a7   : > { %v581_v60 = vpop.permute.xlu0 %580 }
 0x2a8   : > { %v582_v61 = vsel %vm371_vm1, %v579_v59, %v581_v60  ;;  %v583_v62 = vsel %vm371_vm1, %v581_v60, %v579_v59 }
 0x2a9   : > { %v584_v0 = vmul.f32 %v583_v62, %v1219_v27  ;;  %v585_v2 = vmul.f32 %v582_v61, %v1225_v29 }
 0x2aa   : > { %v587_v3 = vpop.permute.xlu1 %586 }
 0x2ab   : > { %v589_v4 = vpop.permute.xlu0 %588  ;;  %v836_v5 = vpack.c.bf16 %v585_v2, %v577_v1  ;;  %v838_v6 = vpack.c.bf16 %v584_v0, %v576_v63 }
 0x2ac   : > { %v590_v7 = vsel %vm388_vm2, %v587_v3, %v589_v4  ;;  %v591_v8 = vsel %vm388_vm2, %v589_v4, %v587_v3 }
 0x2ad   : > { %837 = vmatprep.subr.bf16.mxu1 %v836_v5  ;;  %v592_v29 = vmul.f32 %v591_v8, %v1243_v45  ;;  %v593_v10 = vmul.f32 %v590_v7, %v1247_v48 }
 0x2ae   : > { %839 = vmatpush1.bf16.msra.mxu1 %v838_v6  ;;  %v595_v9 = vpop.permute.xlu1 %594 }
 0x2af   : > { %v597_v26 = vpop.permute.xlu0 %596 }
 0x2b0   : > { %v598_v27 = vsel %vm405_vm3, %v595_v9, %v597_v26  ;;  %v599_v28 = vsel %vm405_vm3, %v597_v26, %v595_v9 }
 0x2b1   : > { %v600_v14 = vmul.f32 %v599_v28, %v1251_v49  ;;  %v601_v12 = vmul.f32 %v598_v27, %v1254_v50 }
 0x2b2   : > { %v603_v11 = vpop.permute.xlu1 %602 }
 0x2b3   : > { %v605_v18 = vpop.permute.xlu0 %604  ;;  %v840_v20 = vpack.c.bf16 %v601_v12, %v593_v10  ;;  %v842_v22 = vpack.c.bf16 %v600_v14, %v592_v29 }
 0x2b4   : > { %v606_v21 = vsel %vm422_vm4, %v603_v11, %v605_v18  ;;  %v607_v23 = vsel %vm422_vm4, %v605_v18, %v603_v11 }
 0x2b5   : > { %v608_v24 = vmul.f32 %v606_v21, %v1266_v56  ;;  %v609_v45 = vmul.f32 %v607_v23, %v1269_v57  ;;  %841 = vmatprep.subr.bf16.mxu1 %v840_v20 }
 0x2b6   : > { %843 = vmatpush1.bf16.msra.mxu1 %v842_v22  ;;  %v611_v48 = vpop.permute.xlu1 %610 }
 0x2b7   : > { %v613_v49 = vpop.permute.xlu0 %612  ;;  %v844_v25 = vpack.c.bf16 %v609_v45, %v567_v51  ;;  %v846_v50 = vpack.c.bf16 %v608_v24, %v1326_v47 }
 0x2b8   : > { %v614_v31 = vsel %vm439_vm5, %v611_v48, %v613_v49  ;;  %v615_v32 = vsel %vm439_vm5, %v613_v49, %v611_v48 }
 0x2b9   : > { %845 = vmatprep.subr.bf16.mxu1 %v844_v25  ;;  %v616_v35 = vmul.f32 %v614_v31, %v1287_v13  ;;  %v617_v37 = vmul.f32 %v615_v32, %v1290_v15 }
 0x2ba   : > { %847 = vmatpush1.bf16.msra.mxu1 %v846_v50  ;;  %v619_v33 = vpop.permute.xlu1 %618 }
 0x2bb   : > { %v621_v34 = vpop.permute.xlu0 %620 }
 0x2bc   : > { %v622_v56 = vsel %vm456_vm6, %v619_v33, %v621_v34  ;;  %v623_v57 = vsel %vm456_vm6, %v621_v34, %v619_v33 }
 0x2bd   : > { %v624_v38 = vmul.f32 %v622_v56, %v1294_v16  ;;  %v625_v39 = vmul.f32 %v623_v57, %v1297_v17  ;;  %v569_v16 = vld [vmem:[%s1461_s6] sm:$0xff] }
 0x2be   : > { %v627_v40 = vpop.permute.xlu1 %626 }
 0x2bf   : > { %v629_v41 = vpop.permute.xlu0 %628  ;;  %v848_v42 = vpack.c.bf16 %v625_v39, %v617_v37  ;;  %v850_v43 = vpack.c.bf16 %v624_v38, %v616_v35 }
 0x2c0   : > { %v631_v44 = vsel %vm473_vm7, %v629_v41, %v627_v40  ;;  %v630_v46 = vsel %vm473_vm7, %v627_v40, %v629_v41 }
 0x2c1   : > { %v633_v13 = vmul.f32 %v1312_v30, %v631_v44  ;;  %849 = vmatprep.subr.bf16.mxu1 %v848_v42  ;;  %v632_v15 = vmul.f32 %v1316_v36, %v630_v46 }
 0x2c2   : > { %851 = vmatpush1.bf16.msra.mxu1 %v850_v43 }
 0x2c3   : > { %658 = vmatprep.subr.mxu1 %v633_v13 }
 0x2c6   : > { %659 = vmatpush1.msra.mxu1 %v632_v15 }
 0x2c7   : > { %813 = vmatmul.mubr.msk.f32.vlgmr.msra.gmra.mrb[0].mxu1 %vm491_vm8, %v569_v16 }
 0x2cf   : > { %v637_v17 = vpop.permute.xlu1 %636 }
 0x39a   : > { %v708_v19 = vpop.f32.mrb[0].mxu1 }
 0x39b   : > { %v709_v30 = vadd.f32 %v708_v19, %v637_v17  ;;  %v710_v47 = vpop.f32.mrb[1].mxu1 }
 0x39c   : > { %v711_v51 = vadd.f32 %v710_v47, %v637_v17 }
 0x39d   : > { %713 = vst [vmem:[%s314_s20] sm:$0xff] %v709_v30 }
 0x39e   : > { %714 = vst [vmem:[%s314_s20 + $0x8] sm:$0xff] %v711_v51 }
 0x39f   : > { %957 = shalt.err (!%p954_p7)
}
 0x3a0   : > { %s958_s21 = scalar_lea.hbm %s1413_s26, 256  ;;  %s962_s24 = scalar_lea.hbm %s1463_s8, 512 }
 0x3a1   : > { %p959_p8 = scmp.ne.s32.totalorder %s1413_s26, %s958_s21  ;;  %p963_p1 = scmp.lt.u32.totalorder %s1413_s26, %s1463_s8 }
 0x3a2   : > { %p964_p0 = scmp.lt.u32.totalorder %s962_s24, %s958_s21  ;;  %p966_p6 = scmp.lt.u32.totalorder %s958_s21, %s1413_s26 }
 0x3a3   : > { %p960_p11 = pnand %p959_p8, %p1474_p9 }
 0x3a4   : > { %p965_p5 = por %p964_p0, %p963_p1 }
 0x3a5   : > { %p961_p13 = pneg %p960_p11 }
 0x3a6   : > { %p967_p10 = por %p966_p6, %p965_p5 }
 0x3a8   : > { %p968_p12 = pnand %p967_p10, %p961_p13 }
 0x3aa   : > { %971 = shalt.err (!%p968_p12)
}
 0x3ab   : > { %856 = dma.vmem_to_hbm [thread:$0]  (%p1474_p9), %s1415_s19, 256, %s1413_s26, %s716_s10  }
 0x3ac PF: > { %p868_p2 = scmp.ge.s32.totalorder %s1010_s30, 2  ;;  %s742_s25 = sand.u32 1, %s998_s27  }
 0x3ad   : > { %p1475_p3 = scmp.ne.s32.totalorder %s1468_s16, 0  ;;  %s743_s9 = scalar_lea.sflag [#allocation4], %s742_s25 }
 0x3af   : > { %p863_p4 = pnand %p868_p2, %p1475_p3 }
 0x3b1   : > { %993 = dma.done.wait (!%p863_p4), %s743_s9, 256  }
 0x3b2   : > { %995 = vsyncadd (!%p863_p4), %s743_s9, 4294967040  ;;  %p19_p7 = scmp.ge.s32.totalorder %s1096_s11, 4   ;;  %s1476_s27 = smov %s1002_s28 }
 0x3b3   : > { %s1477_s28 = smov %s1006_s29  ;;  %s1478_s29 = smov %s1107_s14 }
 0x3b4   : > { %s1479_s30 = smov %s1096_s11  ;;  %21 = sbr.rel (!%p19_p7) target bundleno = 4 (0x4), region = 92 }
 0x3bb   :  { %748 = vsyncpa [#allocation3], 1 }
 0x3bc   :  { %750 = vsyncpa [#allocation3 + $0x1], 1 }
 0x3bd   :  { %751 = vsyncpa [#allocation4], 1 }
 0x3be   :  { %753 = vsyncpa [#allocation4 + $0x1], 1 }

</bundles_post_ra>
